<compile_context>
chip_gen: v5e
topology: v5e:2x2
jax: 0.10.0
libtpu: 0.0.40
codegen_flags: <defaults>
</compile_context>

<pallas_src>
import math

import jax
import jax.numpy as jnp
from jax.experimental import pallas as pl
from jax.experimental.pallas import tpu as pltpu

_C1 = math.sqrt(2.0 / math.pi)   # sqrt(2/pi)
_C2 = 0.044715 * _C1             # folded: C1*(x + a*x^3) == x*(C1 + C2*x^2)

_MIN_SPLIT_BYTES = 2 * 1024 * 1024   # force >=2 grid blocks above this size (megacore)


def _gelu_kernel(x_ref, o_ref):
    # f32 math keeps tanh on the EUP slot on every generation; HBM-bound so the
    # upcast is free.
    # TODO(synk): if a bundle dump ever shows the EUP slot binding for bf16 inputs
    # on v6e/v7x, evaluate tanh in bf16 there (keep f32 on v5e).
    x = x_ref[...].astype(jnp.float32)
    inner = x * (_C1 + _C2 * (x * x))       # one VPU multiply saved vs (x + a*x^3)*C1
    y = 0.5 * x * (1.0 + jnp.tanh(inner))   # tanh -> EUP slot
    o_ref[...] = y.astype(o_ref.dtype)


def gelu_ref(x):
    # Pure-JAX reference matching the PyTorch module exactly (also used for the
    # tiny <128-element ragged tail).
    return 0.5 * x * (1.0 + jnp.tanh(jnp.sqrt(2.0 / jnp.pi) * (x + 0.044715 * x ** 3)))


def _cdiv(a, b):
    return -(-a // b)


def _round_up(a, m):
    return _cdiv(a, m) * m


def _device_params():
    """Return (target_block_bytes, vmem_limit_bytes) tuned per TPU generation."""
    kind = ""
    try:
        kind = jax.devices()[0].device_kind.lower()
    except Exception:
        pass
    if "v7" in kind:
        # 64 MiB physical VMEM, ~3.2 TB/s/TC: 8 MiB blocks cut the 0.35 us/step
        # overhead to ~5%; double-buffered in+out = 32 MiB < 48 MiB limit.
        return 8 * 1024 * 1024, 48 * 1024 * 1024
    if "v6" in kind:
        # 128 MiB physical VMEM, ~1.4 TB/s: bigger blocks are free headroom-wise.
        return 12 * 1024 * 1024, 64 * 1024 * 1024
    # v5e and unknown chips: conservative; the explicit 32 MiB raise matters on
    # v5e whose default scoped VMEM is only 16 MiB.
    return 4 * 1024 * 1024, 32 * 1024 * 1024


def _gelu_2d(x2d, *, target_block_bytes, vmem_limit_bytes, donate=False):
    """Run the kernel on a lane-aligned (rows, lane) array; lane % 128 == 0 or lane == full."""
    rows, lane = x2d.shape
    dtype = x2d.dtype
    itemsize = jnp.dtype(dtype).itemsize
    sub = max(8, 32 // itemsize)            # native sublane packing: 8 f32 / 16 bf16 / 32 i8

    # ---- pick (tile_rows, tile_lane): biggest block within the byte budget ----
    if lane * itemsize * min(rows, sub) > target_block_bytes:
        # Very wide rows: tile the lane axis too (2-D grid) so blocks cannot
        # exceed VMEM (worst on v7x's 64 MiB physical VMEM).
        tile_rows = min(rows, sub)
        budget = max(128, (target_block_bytes // (tile_rows * itemsize)) // 128 * 128)
        tile_lane = min(lane, budget)
        if lane % tile_lane != 0:           # prefer a divisor -> unmasked vst on every block
            t = tile_lane
            for _ in range(8):
                t -= 128
                if t < 128:
                    break
                if lane % t == 0:
                    tile_lane = t
                    break
    else:
        tile_lane = lane
        tr = target_block_bytes // (lane * itemsize)
        tr = max(sub, (tr // sub) * sub)    # sublane-pack aligned
        tile_rows = min(rows, tr)

    # ---- megacore: guarantee >=2 (ideally even # of) blocks for non-trivial arrays
    #      so both v7x TensorCores get work under dimension_semantics="parallel" ----
    total_bytes = rows * lane * itemsize
    if total_bytes >= _MIN_SPLIT_BYTES:
        n_blocks = _cdiv(rows, tile_rows) * _cdiv(lane, tile_lane)
        if n_blocks == 1:
            if rows > sub:
                tile_rows = min(rows, _round_up(_cdiv(rows, 2), sub))
            elif lane > 128:
                tile_lane = min(lane, _round_up(_cdiv(lane, 2), 128))
        elif tile_lane == lane:
            nrb = _cdiv(rows, tile_rows)
            if nrb % 2 == 1 and nrb <= 7 and rows > sub:
                cand = _round_up(_cdiv(rows, nrb + 1), sub)
                if cand >= sub and _cdiv(rows, cand) % 2 == 0:
                    tile_rows = cand        # even block count -> no idle TC on the tail

    grid = (_cdiv(rows, tile_rows), _cdiv(lane, tile_lane))
    return pl.pallas_call(
        _gelu_kernel,
        out_shape=jax.ShapeDtypeStruct(x2d.shape, dtype),
        grid=grid,
        in_specs=[pl.BlockSpec((tile_rows, tile_lane), lambda i, j: (i, j))],
        out_specs=pl.BlockSpec((tile_rows, tile_lane), lambda i, j: (i, j)),
        compiler_params=pltpu.CompilerParams(
            dimension_semantics=("parallel", "parallel"),  # both axes independent
            vmem_limit_bytes=vmem_limit_bytes,
        ),
        input_output_aliases=({0: 0} if donate else {}),
    )(x2d)


def gelu_pallas(x, *, donate=False):
    """tanh-GELU (PyTorch GELU module), elementwise, via a Pallas TPU kernel."""
    orig_shape = x.shape
    n_elems = x.size
    if n_elems == 0:
        return x
    target_block_bytes, vmem_limit_bytes = _device_params()
    hidden = orig_shape[-1] if len(orig_shape) >= 1 else 1

    if len(orig_shape) >= 2 and hidden % 128 == 0:
        # Last dim already lane-aligned: zero-copy reshape to (rows, hidden).
        out2d = _gelu_2d(x.reshape(n_elems // hidden, hidden),
                         target_block_bytes=target_block_bytes,
                         vmem_limit_bytes=vmem_limit_bytes, donate=donate)
        return out2d.reshape(orig_shape)

    # Lane-dense fold: flatten and reshape to (rows, W) with W a multiple of 128
    # so all stores are full vst's (the demo hidden=32 hits this path).
    flat = x.reshape(-1)
    lane = next((w for w in (4096, 2048, 1024, 512, 256, 128) if n_elems % w == 0), None)
    if lane is not None:
        out2d = _gelu_2d(flat.reshape(n_elems // lane, lane),
                         target_block_bytes=target_block_bytes,
                         vmem_limit_bytes=vmem_limit_bytes, donate=donate)
        return out2d.reshape(orig_shape)

    # Ragged case (element count not a multiple of 128): no full-array pad/slice
    # round-trips — 128-aligned body through the kernel, <128-element tail in JAX.
    n_body = (n_elems // 128) * 128
    if n_body == 0:
        # Tiny (<128 elements): a kernel launch is pure overhead.
        return gelu_ref(x)
    body = jax.lax.slice(flat, (0,), (n_body,))
    tail = jax.lax.slice(flat, (n_body,), (n_elems,))
    out_body = _gelu_2d(body.reshape(n_body // 128, 128),
                        target_block_bytes=target_block_bytes,
                        vmem_limit_bytes=vmem_limit_bytes).reshape(-1)
    out_tail = gelu_ref(tail)
    return jnp.concatenate([out_body, out_tail]).reshape(orig_shape)


if __name__ == "__main__":
    key = jax.random.PRNGKey(0)
    # Transformer-activation-like shape implied by the module: (batch=2, seq=8, hidden=32).
    x = jax.random.normal(key, (2, 8, 32), dtype=jnp.float32)

    out = jax.block_until_ready(gelu_pallas(x))
    ref = gelu_ref(x)

    assert out.shape == x.shape and out.dtype == x.dtype
    assert jnp.allclose(out, ref, atol=1e-5, rtol=1e-5), "mismatch vs reference"

    print("KERNEL_OK")
</pallas_src>

<mosaic_0001>
module attributes {stable_mosaic.version = 11 : i64} {
  func.func @_gelu_kernel(%arg0: i32, %arg1: i32, %arg2: memref<1x512xf32, #tpu.memory_space<vmem>>, %arg3: memref<1x512xf32, #tpu.memory_space<vmem>>) attributes {dimension_semantics = [#tpu.dimension_semantics<parallel>, #tpu.dimension_semantics<parallel>], iteration_bounds = array<i64: 1, 1>, scalar_prefetch = 0 : i64, scratch_operands = 0 : i64, tpu.core_type = #tpu.core_type<tc>, window_params = [{transform_indices = @transform_0, window_bounds = array<i64: 1, 512>}, {transform_indices = @transform_1, window_bounds = array<i64: 1, 512>}]} {
    %c0 = arith.constant 0 : index
    %c0_0 = arith.constant 0 : index
    %0 = vector.load %arg2[%c0, %c0_0] : memref<1x512xf32, #tpu.memory_space<vmem>>, vector<1x512xf32>
    %1 = arith.mulf %0, %0 : vector<1x512xf32>
    %cst = arith.constant 0.0356774069 : f32
    %2 = vector.broadcast %cst : f32 to vector<1x512xf32>
    %3 = arith.mulf %2, %1 : vector<1x512xf32>
    %cst_1 = arith.constant 0.797884583 : f32
    %4 = vector.broadcast %cst_1 : f32 to vector<1x512xf32>
    %5 = arith.addf %4, %3 : vector<1x512xf32>
    %6 = arith.mulf %0, %5 : vector<1x512xf32>
    %cst_2 = arith.constant 5.000000e-01 : f32
    %7 = vector.broadcast %cst_2 : f32 to vector<1x512xf32>
    %8 = arith.mulf %7, %0 : vector<1x512xf32>
    %9 = math.tanh %6 : vector<1x512xf32>
    %cst_3 = arith.constant 1.000000e+00 : f32
    %10 = vector.broadcast %cst_3 : f32 to vector<1x512xf32>
    %11 = arith.addf %10, %9 : vector<1x512xf32>
    %12 = arith.mulf %8, %11 : vector<1x512xf32>
    %c0_4 = arith.constant 0 : index
    %c0_5 = arith.constant 0 : index
    %13 = vector.load %arg3[%c0_4, %c0_5] : memref<1x512xf32, #tpu.memory_space<vmem>>, vector<1x512xf32>
    tpu.vector_store %arg3[%c0_4, %c0_5], %12 {strides = array<i32>} : memref<1x512xf32, #tpu.memory_space<vmem>>, vector<1x512xf32>,
    return
  }
  func.func @transform_0(%arg0: i32, %arg1: i32) -> (i32, i32) {
    %c0_i32 = arith.constant 0 : i32
    return %arg0, %arg1 : i32, i32
  }
  func.func @transform_1(%arg0: i32, %arg1: i32) -> (i32, i32) {
    %c0_i32 = arith.constant 0 : i32
    return %arg0, %arg1 : i32, i32
  }
}

</mosaic_0001>

<bundles_post_ra>
// kernel: tpu_custom_call.1
= control target key start
LH: loop header
LB: loop body
LE: loop exit
PB: predicated region body
PF: predicated region fallthrough
CT: control target
= control target key end

     0   :  { %6 = vsyncpa [#allocation3], 0  ;;  %s128_s0 = inlined_call_operand.hbm [shape: f32[1,512], index: 0, kind: input, shape index: {}]   ;;  %s129_s1 = inlined_call_operand.hbm [shape: f32[1,512], index: 1, kind: output, shape index: {}]  }
   0x1   :  { %7 = vsyncpa [#allocation4], 0  ;;  %s13_s8 = sshll.u32 %s128_s0, 4  ;;  %s110_s9 = smov [#allocation2]   ;;  %s14_s8 = int_to_ptr.hbm [resolvable:$true] %s13_s8 }
   0x2   :  { %s15_s10 = sshll.u32 %s110_s9, 4  ;;  %s16_s10 = int_to_ptr.vmem [resolvable:$true] %s15_s10 }
   0x3   :  { %18 = dma.hbm_to_vmem [thread:$0]  %s14_s8, 64, %s16_s10, [#allocation3]  }
   0x4   :  { %106 = dma.done.wait [#allocation3], 64  }
   0x5   :  { %107 = vsyncadd [#allocation3], 4294967232  ;;  %v23_v0 = vld [vmem:[#allocation2] sm:$0xf]  ;;  %v32_v5 = vlaneseq  ;;  %s111_s11 = smov [#allocation5]   ;;  %s44_s14 = sshll.u32 %s129_s1, 4  ;;  %s45_s14 = int_to_ptr.hbm [resolvable:$true] %s44_s14 }
   0x6   :  { %v24_v1 = vmul.f32 %v23_v0, %v23_v0  ;;  %v28_v6 = vmul.f32 0.5, %v23_v0  ;;  %s42_s12 = sshll.u32 %s111_s11, 4  ;;  %s43_s12 = int_to_ptr.vmem [resolvable:$true] %s42_s12 }
   0x7   :  { %vm34_vm0 = vcmp.lt.s32.totalorder %v32_v5, 512 }
   0x8   :  { %v25_v2 = vmul.f32 0.035677407, %v24_v1 }
   0xa   :  { %v26_v3 = vadd.f32 0.7978846, %v25_v2 }
   0xc   :  { %v27_v4 = vmul.f32 %v26_v3, %v23_v0 }
   0xe   :  { %56 = vtanh.f32 %v27_v4 }
  0x14   :  { %v57_v7 = vpop.eup %56 }
  0x15   :  { %v30_v8 = vadd.f32 1.0, %v57_v7 }
  0x17   :  { %v31_v9 = vmul.f32 %v30_v8, %v28_v6 }
  0x19   :  { %36 = vst.msk [vmem:[#allocation5] sm:$0xf] %vm34_vm0, %v31_v9 }
  0x1a   :  { %47 = dma.vmem_to_hbm [thread:$0]  %s43_s12, 64, %s45_s14, [#allocation4]  }
  0x1b   :  { %108 = dma.done.wait [#allocation4], 64  }
  0x1c   :  { %109 = vsyncadd [#allocation4], 4294967232 }
  0x1d   :  { %52 = vsyncpa [#allocation3], 1 }
  0x1e   :  { %53 = vsyncpa [#allocation4], 1 }

</bundles_post_ra>
